<compile_context>
chip_gen: v7x
topology: tpu7x:2x2x1
jax: 0.10.0
libtpu: 0.0.40
codegen_flags: <defaults>
</compile_context>

<pallas_src>
import jax
import jax.numpy as jnp
from jax.experimental import pallas as pl
from jax.experimental.pallas import tpu as pltpu  # noqa: F401  (TPU backend assumed)

IN_DIM = 1
HIDDEN = 32
OUT_DIM = 1
LANES = 128


def mlp_kernel(x_ref, p_ref, o_ref):
    # x_ref: (1, N_pad)   batch on lanes
    # p_ref: (HIDDEN, 4)  packed params: col0=w1, col1=b1, col2=w2, p[0,3]=b2
    # o_ref: (1, N_pad)
    x = x_ref[...]                       # (1, N_pad)
    w1 = p_ref[:, 0:1]                   # (32, 1)
    b1 = p_ref[:, 1:2]                   # (32, 1)
    w2 = p_ref[:, 2:3]                   # (32, 1)
    b2 = p_ref[0:1, 3:4]                 # (1, 1)

    # Layer 1 (VPU outer product) + ReLU: (32, N_pad)
    h = jnp.maximum(w1 * x + b1, 0.0)
    # Layer 2 (weighted sublane reduction): (1, N_pad)
    y = jnp.sum(h * w2, axis=0, keepdims=True) + b2

    o_ref[...] = y.astype(o_ref.dtype)


def pack_params(w1, b1, w2, b2):
    """Pack all parameters into one (HIDDEN, 4) f32 operand. Do this ONCE at init."""
    p = jnp.zeros((HIDDEN, 4), dtype=jnp.float32)
    p = p.at[:, 0].set(w1.reshape(HIDDEN).astype(jnp.float32))
    p = p.at[:, 1].set(b1.reshape(HIDDEN).astype(jnp.float32))
    p = p.at[:, 2].set(w2.reshape(HIDDEN).astype(jnp.float32))
    p = p.at[0, 3].set(b2.reshape(()).astype(jnp.float32))
    return p


@jax.jit
def net_forward(x, packed_params):
    """x: (N, 1) f32; packed_params: (HIDDEN, 4) f32 from pack_params()."""
    n = x.shape[0]
    n_pad = ((n + LANES - 1) // LANES) * LANES

    # Batch -> lanes, zero-padded to a multiple of 128 (fuses under jit).
    x_row = x.reshape(1, n).astype(jnp.float32)
    x_t = jnp.pad(x_row, ((0, 0), (0, n_pad - n)))

    full = lambda shape: pl.BlockSpec(shape, lambda: (0,) * len(shape))

    out = pl.pallas_call(
        mlp_kernel,
        out_shape=jax.ShapeDtypeStruct((1, n_pad), jnp.float32),
        grid_spec=pl.GridSpec(
            grid=(),
            in_specs=[
                full((1, n_pad)),
                full((HIDDEN, 4)),
            ],
            out_specs=full((1, n_pad)),
        ),
    )(x_t, packed_params)

    # Back to the module's (N, 1) output shape (padded lanes discarded).
    return out[0, :n].reshape(n, OUT_DIM)


def init_params(key):
    # Mimics PyTorch nn.Linear default init:
    # U(-1/sqrt(fan_in), 1/sqrt(fan_in)) for both weights and biases.
    k1, k2, k3, k4 = jax.random.split(key, 4)
    bound1 = 1.0 / jnp.sqrt(jnp.float32(IN_DIM))
    bound2 = 1.0 / jnp.sqrt(jnp.float32(HIDDEN))
    w1 = jax.random.uniform(k1, (IN_DIM, HIDDEN), jnp.float32, -bound1, bound1)
    b1 = jax.random.uniform(k2, (1, HIDDEN), jnp.float32, -bound1, bound1)
    w2 = jax.random.uniform(k3, (HIDDEN, OUT_DIM), jnp.float32, -bound2, bound2)
    b2 = jax.random.uniform(k4, (1, OUT_DIM), jnp.float32, -bound2, bound2)
    return w1, b1, w2, b2


if __name__ == "__main__":
    key = jax.random.PRNGKey(0)
    k_x, k_p = jax.random.split(key)

    num_datapoints = 50
    # x = rand(N, 1) * 200 - 100, as in the reference script
    x = jax.random.uniform(k_x, (num_datapoints, IN_DIM), jnp.float32) * 200.0 - 100.0

    w1, b1, w2, b2 = init_params(k_p)
    packed = pack_params(w1, b1, w2, b2)   # one-time packing, hoisted out of forward
    packed = jax.block_until_ready(packed)

    out = net_forward(x, packed)
    out = jax.block_until_ready(out)

    # Pure-JAX reference check of the same math.
    ref = jnp.maximum(x @ w1 + b1, 0.0) @ w2 + b2
    assert out.shape == (num_datapoints, OUT_DIM)
    assert jnp.allclose(out, ref, atol=1e-5, rtol=1e-5)

    print("KERNEL_OK")
</pallas_src>

<mosaic_0001>
module attributes {stable_mosaic.version = 11 : i64} {
  func.func @mlp_kernel(%arg0: memref<1x128xf32, #tpu.memory_space<vmem>>, %arg1: memref<32x4xf32, #tpu.memory_space<vmem>>, %arg2: memref<1x128xf32, #tpu.memory_space<vmem>>) attributes {dimension_semantics = [], scalar_prefetch = 0 : i64, scratch_operands = 0 : i64, tpu.core_type = #tpu.core_type<tc>} {
    %c0 = arith.constant 0 : index
    %c0_0 = arith.constant 0 : index
    %0 = vector.load %arg0[%c0, %c0_0] : memref<1x128xf32, #tpu.memory_space<vmem>>, vector<1x128xf32>
    %c0_1 = arith.constant 0 : index
    %c0_2 = arith.constant 0 : index
    %1 = vector.load %arg1[%c0_1, %c0_2] : memref<32x4xf32, #tpu.memory_space<vmem>>, vector<32x1xf32>
    %c0_3 = arith.constant 0 : index
    %c1 = arith.constant 1 : index
    %2 = vector.load %arg1[%c0_3, %c1] : memref<32x4xf32, #tpu.memory_space<vmem>>, vector<32x1xf32>
    %c0_4 = arith.constant 0 : index
    %c2 = arith.constant 2 : index
    %3 = vector.load %arg1[%c0_4, %c2] : memref<32x4xf32, #tpu.memory_space<vmem>>, vector<32x1xf32>
    %c0_5 = arith.constant 0 : index
    %c3 = arith.constant 3 : index
    %4 = vector.load %arg1[%c0_5, %c3] : memref<32x4xf32, #tpu.memory_space<vmem>>, vector<1x1xf32>
    %5 = vector.broadcast %1 : vector<32x1xf32> to vector<32x128xf32>
    %6 = vector.broadcast %0 : vector<1x128xf32> to vector<32x128xf32>
    %7 = arith.mulf %5, %6 : vector<32x128xf32>
    %8 = vector.broadcast %2 : vector<32x1xf32> to vector<32x128xf32>
    %9 = arith.addf %7, %8 : vector<32x128xf32>
    %cst = arith.constant 0.000000e+00 : f32
    %10 = vector.broadcast %cst : f32 to vector<32x128xf32>
    %11 = arith.maximumf %9, %10 : vector<32x128xf32>
    %12 = vector.broadcast %3 : vector<32x1xf32> to vector<32x128xf32>
    %13 = arith.mulf %11, %12 : vector<32x128xf32>
    %cst_6 = arith.constant dense<0.000000e+00> : vector<128xf32>
    %14 = vector.multi_reduction <add>, %13, %cst_6 [0] : vector<32x128xf32> to vector<128xf32>
    %15 = vector.shape_cast %14 : vector<128xf32> to vector<1x128xf32>
    %16 = vector.broadcast %4 : vector<1x1xf32> to vector<1x128xf32>
    %17 = arith.addf %15, %16 : vector<1x128xf32>
    %c0_7 = arith.constant 0 : index
    %c0_8 = arith.constant 0 : index
    %18 = vector.load %arg2[%c0_7, %c0_8] : memref<1x128xf32, #tpu.memory_space<vmem>>, vector<1x128xf32>
    tpu.vector_store %arg2[%c0_7, %c0_8], %17 {strides = array<i32>} : memref<1x128xf32, #tpu.memory_space<vmem>>, vector<1x128xf32>,
    return
  }
}

</mosaic_0001>

<bundles_post_ra>
// kernel: net_forward.1
= control target key start
LH: loop header
LB: loop body
LE: loop exit
PB: predicated region body
PF: predicated region fallthrough
CT: control target
= control target key end

     0   :  { %v125_v0 = vmov 0   ;;  %v126_v4 = vmov 1   ;;  %v127_v6 = vmov 2   ;;  %v128_v8 = vmov 3   ;;  %s165_s1 = inlined_call_operand.vmem [shape: f32[32,4], index: 1, kind: input, shape index: {}]   ;;  %s166_s0 = inlined_call_operand.vmem [shape: f32[1,128], index: 0, kind: input, shape index: {}]   ;;  %s167_s2 = inlined_call_operand.vmem [shape: f32[1,128], index: 2, kind: output, shape index: {}]  }
   0x1   :  { %117 = vset.pattern.permute.xlu1 %v125_v0  ;;  %116 = vset.pattern.permute.xlu0 %v125_v0  ;;  %v14_v1 = vld [vmem:[%s165_s1 + $0x10] sm:$0xff]  ;;  %v12_v2 = vld [vmem:[%s165_s1] sm:$0xff]  ;;  %v13_v3 = vld [vmem:[%s165_s1 + $0x8] sm:$0xff] }
   0x2   :  { %29 = vperm.xlu1 %117, %v14_v1   ;;  %19 = vperm.xlu0 %116, %v12_v2   ;;  %v15_v5 = vld [vmem:[%s165_s1 + $0x18] sm:$0xff]  ;;  %v16_v7 = vld [vmem:[%s165_s1] sm:$0x1] }
   0x3   :  { %v111_v15 = vld [vmem:[%s166_s0] ss:$0 sm:$0xff] }
   0x6   :  { %118 = vset.pattern.permute.xlu1 %v126_v4  ;;  %24 = vperm.xlu0 %116, %v13_v3  }
   0x7   :  { %48 = vperm.xlu1 %118, %v12_v2  }
   0xa   :  { %119 = vset.pattern.permute.xlu0 %v126_v4 }
   0xb   :  { %120 = vset.pattern.permute.xlu1 %v125_v0  ;;  %52 = vperm.xlu0 %119, %v13_v3  }
   0xc   :  { %34 = vperm.xlu1 %120, %v15_v5  }
   0xf   :  { %60 = vperm.xlu0 %119, %v15_v5  }
  0x10   :  { %121 = vset.pattern.permute.xlu1 %v126_v4 }
  0x11   :  { %56 = vperm.xlu1 %121, %v14_v1  }
  0x13   :  { %123 = vset.pattern.permute.xlu0 %v127_v6 }
  0x14   :  { %76 = vperm.xlu0 %123, %v13_v3  }
  0x15   :  { %122 = vset.pattern.permute.xlu1 %v127_v6 }
  0x16   :  { %72 = vperm.xlu1 %122, %v12_v2  }
  0x18   :  { %124 = vset.pattern.permute.xlu0 %v128_v8 }
  0x19   :  { %102 = vperm.xlu0 %124, %v16_v7  }
  0x1a   :  { %80 = vperm.xlu1 %122, %v14_v1  }
  0x1e   :  { %84 = vperm.xlu1 %122, %v15_v5  }
  0x81   :  { %v30_v9 = vpop.permute.xlu1 %29  ;;  %v20_v10 = vpop.permute.xlu0 %19 }
  0x82   :  { %v43_v16 = vmul.f32 %v111_v15, %v20_v10  ;;  %v45_v20 = vmul.f32 %v111_v15, %v30_v9 }
  0x85   :  { %v25_v11 = vpop.permute.xlu0 %24 }
  0x86   :  { %v49_v12 = vpop.permute.xlu1 %48  ;;  %v44_v17 = vmul.f32 %v111_v15, %v25_v11 }
  0x87   :  { %v63_v21 = vadd.f32 %v49_v12, %v43_v16 }
  0x89   :  { %v67_v26 = vmax.f32 %v63_v21, 0.0 }
  0x8a   :  { %v53_v13 = vpop.permute.xlu0 %52 }
  0x8b   :  { %v35_v14 = vpop.permute.xlu1 %34  ;;  %v64_v22 = vadd.f32 %v53_v13, %v44_v17 }
  0x8c   :  { %v46_v23 = vmul.f32 %v111_v15, %v35_v14 }
  0x8d   :  { %v68_v28 = vmax.f32 %v64_v22, 0.0 }
  0x8e   :  { %v61_v19 = vpop.permute.xlu0 %60 }
  0x8f   :  { %v66_v29 = vadd.f32 %v61_v19, %v46_v23 }
  0x90   :  { %v57_v18 = vpop.permute.xlu1 %56 }
  0x91   :  { %v65_v24 = vadd.f32 %v57_v18, %v45_v20  ;;  %v70_v35 = vmax.f32 %v66_v29, 0.0 }
  0x93   :  { %v77_v27 = vpop.permute.xlu0 %76  ;;  %v69_v30 = vmax.f32 %v65_v24, 0.0 }
  0x94   :  { %v88_v33 = vmul.f32 %v77_v27, %v68_v28 }
  0x95   :  { %v73_v25 = vpop.permute.xlu1 %72 }
  0x96   :  { %v87_v31 = vmul.f32 %v73_v25, %v67_v26 }
  0x98   :  { %v91_v36 = vadd.f32 %v88_v33, %v87_v31  ;;  %v103_v46 = vpop.permute.xlu0 %102 }
  0x99   :  { %v81_v32 = vpop.permute.xlu1 %80 }
  0x9a   :  { %v89_v34 = vmul.f32 %v81_v32, %v69_v30 }
  0x9c   :  { %v92_v38 = vadd.f32 %v91_v36, %v89_v34 }
  0x9d   :  { %v85_v37 = vpop.permute.xlu1 %84 }
  0x9e   :  { %v90_v39 = vmul.f32 %v85_v37, %v70_v35 }
  0xa0   :  { %v93_v40 = vadd.f32 %v92_v38, %v90_v39 }
  0xa2   :  { %v94_v41 = vrot.slane %v93_v40, 4 }
  0xa4   :  { %v95_v42 = vadd.f32 %v94_v41, %v93_v40 }
  0xa6   :  { %v96_v43 = vrot.slane %v95_v42, 2 }
  0xa8   :  { %v97_v44 = vadd.f32 %v96_v43, %v95_v42 }
  0xaa   :  { %v98_v45 = vrot.slane %v97_v44, 1 }
  0xac   :  { %v99_v47 = vadd.f32 %v98_v45, %v97_v44 }
  0xae   :  { %v105_v48 = vadd.f32 %v103_v46, %v99_v47 }
  0xb0   :  { %106 = vst [vmem:[%s167_s2] sm:$0x1] %v105_v48 }

</bundles_post_ra>
